<compile_context>
chip_gen: v7x
topology: tpu7x:2x2x1
jax: 0.10.0
libtpu: 0.0.40
codegen_flags: <defaults>
</compile_context>

<pallas_src>
import jax
import jax.numpy as jnp
from jax.experimental import pallas as pl
from jax.experimental.pallas import tpu as pltpu


def _round_up(x, m):
    return ((x + m - 1) // m) * m


# ---------------------------------------------------------------------------
# Kernels
# ---------------------------------------------------------------------------
def perceptron_kernel_fused(x_ref, w_ref, b_ref, o_ref):
    """Single-K-step fast path: z = x @ w + bias ; out = step(z)."""
    z = jnp.dot(x_ref[...], w_ref[...], preferred_element_type=jnp.float32)
    z = z + b_ref[...]                      # (1, tn) bias broadcasts over rows
    o_ref[...] = (z >= 0.0).astype(o_ref.dtype)


def perceptron_kernel_acc(x_ref, w_ref, b_ref, o_ref, acc_ref):
    """K-tiled path with a resident f32 accumulator (init with bias at k==0)."""
    k = pl.program_id(2)

    @pl.when(k == 0)
    def _():
        # Start from the bias instead of zeros -> no bias add in the epilogue.
        acc_ref[...] = jnp.broadcast_to(b_ref[...], acc_ref.shape).astype(jnp.float32)

    acc_ref[...] += jnp.dot(
        x_ref[...], w_ref[...], preferred_element_type=jnp.float32
    )

    @pl.when(k == pl.num_programs(2) - 1)
    def _():
        o_ref[...] = (acc_ref[...] >= 0.0).astype(o_ref.dtype)


# ---------------------------------------------------------------------------
# Wrapper
# ---------------------------------------------------------------------------
def perceptron(x, weight, bias, *, tm=512, tn=1024, tk=1024,
               bf16_operands=False, out_dtype=jnp.int8):
    """x: [B, F_in], weight: [F_in, F_out], bias: [F_out] -> [B, F_out] 0/1."""
    B, F_in = x.shape
    F_in_w, F_out = weight.shape
    assert F_in == F_in_w, "x/weight contraction dims must match"

    if bf16_operands:
        # Opt-in: MXU-native dtype, f32 accumulation is kept inside the kernel.
        x = x.astype(jnp.bfloat16)
        weight = weight.astype(jnp.bfloat16)

    # ---- tile clamping ----------------------------------------------------
    tm = min(tm, _round_up(B, 8))
    n_granule = 256 if F_out >= 256 else 128      # 2x256x256 MXU on v6e/v7x
    tn = min(tn, _round_up(F_out, n_granule))

    if F_in <= tk:
        # Whole reduction in one tile -> no K padding, fast-path kernel.
        tk = F_in
        Kp = F_in
    else:
        tk = _round_up(tk, 128)
        Kp = _round_up(F_in, tk)

    # Only K needs explicit zero padding (garbage in OOB K would corrupt the
    # reduction); ragged M/N blocks are handled by the grid and masked stores.
    if Kp != F_in:
        x = jnp.pad(x, ((0, 0), (0, Kp - F_in)))
        weight = jnp.pad(weight, ((0, Kp - F_in), (0, 0)))

    b2 = bias.astype(jnp.float32).reshape(1, F_out)

    grid_m = pl.cdiv(B, tm)
    grid_n = pl.cdiv(F_out, tn)
    grid_k = Kp // tk

    x_bytes = jnp.dtype(x.dtype).itemsize
    w_bytes = jnp.dtype(weight.dtype).itemsize
    o_bytes = jnp.dtype(out_dtype).itemsize

    cost = pl.CostEstimate(
        flops=2 * B * Kp * F_out,
        transcendentals=0,
        bytes_accessed=(B * Kp * x_bytes + Kp * F_out * w_bytes
                        + F_out * 4 + B * F_out * o_bytes),
    )

    # Explicit VMEM budget: double-buffered x/w/bias/out blocks + f32 acc.
    vmem_bytes = (2 * (tm * tk * x_bytes + tk * tn * w_bytes
                       + tn * 4 + tm * tn * o_bytes)
                  + (0 if grid_k == 1 else tm * tn * 4))
    vmem_limit = min(max(vmem_bytes + (8 << 20), 32 << 20), 48 << 20)

    out_shape = jax.ShapeDtypeStruct((B, F_out), out_dtype)

    if grid_k == 1:
        return pl.pallas_call(
            perceptron_kernel_fused,
            out_shape=out_shape,
            grid_spec=pltpu.PrefetchScalarGridSpec(
                num_scalar_prefetch=0,
                grid=(grid_m, grid_n),
                in_specs=[
                    pl.BlockSpec((tm, Kp), lambda i, j: (i, 0)),
                    pl.BlockSpec((Kp, tn), lambda i, j: (0, j)),
                    pl.BlockSpec((1, tn), lambda i, j: (0, j)),
                ],
                out_specs=pl.BlockSpec((tm, tn), lambda i, j: (i, j)),
            ),
            compiler_params=pltpu.CompilerParams(
                dimension_semantics=("parallel", "parallel"),
                vmem_limit_bytes=vmem_limit,
            ),
            cost_estimate=cost,
        )(x, weight, b2)

    return pl.pallas_call(
        perceptron_kernel_acc,
        out_shape=out_shape,
        grid_spec=pltpu.PrefetchScalarGridSpec(
            num_scalar_prefetch=0,
            grid=(grid_m, grid_n, grid_k),
            in_specs=[
                pl.BlockSpec((tm, tk), lambda i, j, k: (i, k)),
                pl.BlockSpec((tk, tn), lambda i, j, k: (k, j)),
                pl.BlockSpec((1, tn), lambda i, j, k: (0, j)),
            ],
            out_specs=pl.BlockSpec((tm, tn), lambda i, j, k: (i, j)),
            scratch_shapes=[pltpu.VMEM((tm, tn), jnp.float32)],
        ),
        compiler_params=pltpu.CompilerParams(
            dimension_semantics=("parallel", "parallel", "arbitrary"),
            vmem_limit_bytes=vmem_limit,
        ),
        cost_estimate=cost,
    )(x, weight, b2)


# ---------------------------------------------------------------------------
# Self-test
# ---------------------------------------------------------------------------
if __name__ == "__main__":
    key = jax.random.PRNGKey(0)
    kx, kw, kb = jax.random.split(key, 3)

    # ---- Test 1: perceptron shapes, fast path (single K step) -------------
    B, F_IN, F_OUT = 8, 32, 128
    x = jax.random.normal(kx, (B, F_IN), dtype=jnp.float32)
    weight = jax.random.normal(kw, (F_IN, F_OUT), dtype=jnp.float32) * 0.1
    bias = jax.random.normal(kb, (F_OUT,), dtype=jnp.float32) * 0.1

    out = jax.block_until_ready(perceptron(x, weight, bias))
    z_ref = x @ weight + bias
    ref = (z_ref >= 0).astype(jnp.int8)
    assert out.shape == (B, F_OUT) and out.dtype == jnp.int8
    assert bool(jnp.all(out == ref))

    # bf16-operand opt-in path: only check where |z| is safely away from 0.
    out_bf16 = jax.block_until_ready(perceptron(x, weight, bias, bf16_operands=True))
    safe = jnp.abs(z_ref) > 5e-2
    assert bool(jnp.all(jnp.where(safe, out_bf16 == ref, True)))

    # ---- Test 2: K-tiled accumulator path (forced small tiles) ------------
    B2, F_IN2, F_OUT2 = 64, 512, 256
    kx2, kw2, kb2 = jax.random.split(jax.random.PRNGKey(1), 3)
    x2 = jax.random.normal(kx2, (B2, F_IN2), dtype=jnp.float32)
    w2 = jax.random.normal(kw2, (F_IN2, F_OUT2), dtype=jnp.float32) * 0.05
    b2 = jax.random.normal(kb2, (F_OUT2,), dtype=jnp.float32) * 0.05

    out2 = jax.block_until_ready(perceptron(x2, w2, b2, tm=64, tn=256, tk=256))
    z2_ref = x2 @ w2 + b2
    ref2 = (z2_ref >= 0).astype(jnp.int8)
    safe2 = jnp.abs(z2_ref) > 1e-2          # tolerate reference rounding near 0
    assert out2.shape == (B2, F_OUT2) and out2.dtype == jnp.int8
    assert bool(jnp.all(jnp.where(safe2, out2 == ref2, True)))

    print("KERNEL_OK")
</pallas_src>

<mosaic_0001>
module attributes {stable_mosaic.version = 11 : i64} {
  func.func @perceptron_kernel_fused(%arg0: i32, %arg1: i32, %arg2: memref<8x32xf32, #tpu.memory_space<vmem>>, %arg3: memref<32x128xf32, #tpu.memory_space<vmem>>, %arg4: memref<1x128xf32, #tpu.memory_space<vmem>>, %arg5: memref<8x128xi8, #tpu.memory_space<vmem>>) attributes {dimension_semantics = [#tpu.dimension_semantics<parallel>, #tpu.dimension_semantics<parallel>], iteration_bounds = array<i64: 1, 1>, scalar_prefetch = 0 : i64, scratch_operands = 0 : i64, tpu.core_type = #tpu.core_type<tc>, window_params = [{transform_indices = @transform_0, window_bounds = array<i64: 8, 32>}, {transform_indices = @transform_1, window_bounds = array<i64: 32, 128>}, {transform_indices = @transform_2, window_bounds = array<i64: 1, 128>}, {transform_indices = @transform_3, window_bounds = array<i64: 8, 128>}]} {
    %c0 = arith.constant 0 : index
    %c0_0 = arith.constant 0 : index
    %0 = vector.load %arg2[%c0, %c0_0] : memref<8x32xf32, #tpu.memory_space<vmem>>, vector<8x32xf32>
    %c0_1 = arith.constant 0 : index
    %c0_2 = arith.constant 0 : index
    %1 = vector.load %arg3[%c0_1, %c0_2] : memref<32x128xf32, #tpu.memory_space<vmem>>, vector<32x128xf32>
    %cst = arith.constant dense<0.000000e+00> : vector<8x128xf32>
    %2 = tpu.matmul %0, %1, %cst {dimension_numbers = #tpu.dot_dimension_numbers<[1], [0], [0], [1], [0, 0, 1, 1], [], []>} : vector<8x32xf32>, vector<32x128xf32>, vector<8x128xf32> -> vector<8x128xf32>
    %c0_3 = arith.constant 0 : index
    %c0_4 = arith.constant 0 : index
    %3 = vector.load %arg4[%c0_3, %c0_4] : memref<1x128xf32, #tpu.memory_space<vmem>>, vector<1x128xf32>
    %4 = vector.broadcast %3 : vector<1x128xf32> to vector<8x128xf32>
    %5 = arith.addf %2, %4 : vector<8x128xf32>
    %cst_5 = arith.constant 0.000000e+00 : f32
    %6 = vector.broadcast %cst_5 : f32 to vector<8x128xf32>
    %7 = arith.cmpf oge, %5, %6 : vector<8x128xf32>
    %8 = arith.extui %7 : vector<8x128xi1> to vector<8x128xi8>
    %c0_6 = arith.constant 0 : index
    %c0_7 = arith.constant 0 : index
    %9 = vector.load %arg5[%c0_6, %c0_7] : memref<8x128xi8, #tpu.memory_space<vmem>>, vector<8x128xi8>
    tpu.vector_store %arg5[%c0_6, %c0_7], %8 {strides = array<i32>} : memref<8x128xi8, #tpu.memory_space<vmem>>, vector<8x128xi8>,
    return
  }
  func.func @transform_0(%arg0: i32, %arg1: i32) -> (i32, i32) {
    %c0_i32 = arith.constant 0 : i32
    %c0_i32_0 = arith.constant 0 : i32
    return %arg0, %c0_i32 : i32, i32
  }
  func.func @transform_1(%arg0: i32, %arg1: i32) -> (i32, i32) {
    %c0_i32 = arith.constant 0 : i32
    %c0_i32_0 = arith.constant 0 : i32
    return %c0_i32, %arg1 : i32, i32
  }
  func.func @transform_2(%arg0: i32, %arg1: i32) -> (i32, i32) {
    %c0_i32 = arith.constant 0 : i32
    %c0_i32_0 = arith.constant 0 : i32
    return %c0_i32, %arg1 : i32, i32
  }
  func.func @transform_3(%arg0: i32, %arg1: i32) -> (i32, i32) {
    %c0_i32 = arith.constant 0 : i32
    return %arg0, %arg1 : i32, i32
  }
}

</mosaic_0001>

<bundles_post_ra>
// kernel: tpu_custom_call.1
= control target key start
LH: loop header
LB: loop body
LE: loop exit
PB: predicated region body
PF: predicated region fallthrough
CT: control target
= control target key end

     0   :  { %8 = vsyncpa [#allocation3], 0  ;;  %s330_s0 = inlined_call_operand.hbm [shape: f32[8,32], index: 0, kind: input, shape index: {}]   ;;  %s331_s1 = inlined_call_operand.hbm [shape: f32[32,128], index: 1, kind: input, shape index: {}]   ;;  %s332_s2 = inlined_call_operand.vmem [shape: f32[1,128], index: 2, kind: input, shape index: {}]   ;;  %s333_s3 = inlined_call_operand.hbm [shape: s8[8,128], index: 3, kind: output, shape index: {}]  }
   0x1   :  { %9 = vsyncpa [#allocation6], 0 }
   0x2   :  { %10 = vsyncpa [#allocation4], 0  ;;  %s255_s12 = smov [#allocation2]   ;;  %s256_s14 = smov [#allocation5]  }
   0x3   :  { %s17_s13 = sshll.u32 %s255_s12, 4  ;;  %s26_s15 = sshll.u32 %s256_s14, 4  ;;  %s18_s13 = int_to_ptr.vmem [resolvable:$true] %s17_s13  ;;  %s284_s15 = int_to_ptr.vmem [resolvable:$true] %s26_s15 }
   0x4   :  { %s183_s18 = scalar_lea.hbm %s330_s0, 128 }
   0x5   :  { %p184_p0 = scmp.ne.s32.totalorder %s330_s0, %s183_s18  ;;  %p187_p1 = scmp.lt.u32.totalorder %s183_s18, %s330_s0 }
   0x7   :  { %p189_p2 = pnand %p187_p1, %p184_p0 }
   0x9   :  { %192 = shalt.err (!%p189_p2)
}
   0xa   :  { %s193_s23 = scalar_lea.vmem %s18_s13, 128  ;;  %p198_p4 = scmp.lt.s32.totalorder %s18_s13, %s18_s13 }
   0xb   :  { %p194_p3 = scmp.ne.s32.totalorder %s18_s13, %s193_s23  ;;  %p199_p5 = scmp.lt.s32.totalorder %s193_s23, %s193_s23 }
   0xd   :  { %p200_p6 = por %p199_p5, %p198_p4 }
   0xf   :  { %p201_p7 = pnand %p200_p6, %p194_p3 }
  0x11   :  { %204 = shalt.err (!%p201_p7)
}
  0x12   :  { %20 = dma.hbm_to_vmem [thread:$0]  %s330_s0, 128, %s18_s13, [#allocation3]  }
  0x13   :  { %s205_s28 = scalar_lea.hbm %s331_s1, 512 }
  0x14   :  { %p206_p8 = scmp.ne.s32.totalorder %s331_s1, %s205_s28  ;;  %p209_p9 = scmp.lt.u32.totalorder %s205_s28, %s331_s1 }
  0x16   :  { %p211_p10 = pnand %p209_p9, %p206_p8 }
  0x18   :  { %214 = shalt.err (!%p211_p10)
}
  0x19   :  { %s215_s6 = scalar_lea.vmem %s284_s15, 512  ;;  %p220_p12 = scmp.lt.s32.totalorder %s284_s15, %s284_s15 }
  0x1a   :  { %p216_p11 = scmp.ne.s32.totalorder %s284_s15, %s215_s6  ;;  %p221_p13 = scmp.lt.s32.totalorder %s215_s6, %s215_s6 }
  0x1c   :  { %p222_p0 = por %p221_p13, %p220_p12 }
  0x1e   :  { %p223_p1 = pnand %p222_p0, %p216_p11 }
  0x20   :  { %226 = shalt.err (!%p223_p1)
}
  0x21   :  { %s257_s0 = smov 128   ;;  %s258_s7 = smov 8  }
  0x22   :  { %32 = dma.hbm_to_vmem [thread:$0]  %s331_s1, 512, %s284_s15, [#allocation6], %s257_s0, %s257_s0, %s258_s7  }
  0x23   :  { %249 = dma.done.wait [#allocation3], 128  }
  0x24   :  { %250 = vsyncadd [#allocation3], 4294967168 }
  0x25   :  { %251 = dma.done.wait [#allocation6], 512  }
  0x26   :  { %252 = vsyncadd [#allocation6], 4294966784  ;;  %v259_v0 = vmov 0.0|0.0   ;;  %vm260_vm0 = vmmov 0   ;;  %v261_v1 = vmov 0.0   ;;  %v44_v2 = vld [vmem:[#allocation5] sm:$0xff] }
  0x27   :  { %168 = vmatprep.subr.bf16.mxu0 %v259_v0  ;;  %165 = vmatprep.mubr.msk.f32.mxu0 %vm260_vm0, %v261_v1  ;;  %v45_v3 = vld [vmem:[#allocation5 + $0x8] sm:$0xff]  ;;  %v46_v4 = vld [vmem:[#allocation5 + $0x10] sm:$0xff]  ;;  %v47_v6 = vld [vmem:[#allocation5 + $0x18] sm:$0xff]  ;;  %vm55_vm1 = vcmask 261120   ;;  %s262_s11 = smov [#allocation7]   ;;  %v263_v13 = vmov 0  }
  0x28   :  { %v169_v5 = vpack.c.bf16 %v45_v3, %v44_v2  ;;  %v172_v7 = vpack.c.bf16 %v47_v6, %v46_v4  ;;  %v43_v8 = vld [vmem:[#allocation2] sm:$0xff]  ;;  %s140_s12 = sshll.u32 %s262_s11, 4  ;;  %s141_s12 = int_to_ptr.vmem [resolvable:$true] %s140_s12 }
  0x29   :  { %v150_v9 = vld [vmem:[%s332_s2] ss:$0 sm:$0xff]  ;;  %s227_s13 = scalar_lea.vmem %s141_s12, 32  ;;  %p232_p3 = scmp.lt.s32.totalorder %s141_s12, %s141_s12 }
  0x2a   :  { %170 = vmatpush3.bf16.msra.mxu0 %v169_v5  ;;  %p228_p2 = scmp.ne.s32.totalorder %s141_s12, %s227_s13  ;;  %p233_p4 = scmp.lt.s32.totalorder %s227_s13, %s227_s13 }
  0x2b   :  { %171 = vmatprep.subr.bf16.mxu0 %v259_v0 }
  0x2c   :  { %p234_p5 = por %p233_p4, %p232_p3 }
  0x2e   :  { %173 = vmatpush3.bf16.msra.mxu0 %v172_v7  ;;  %p235_p6 = pnand %p234_p5, %p228_p2 }
  0x31   :  { %166 = vmatmul.mubr.msk.f32.vlgmr.msra.gmra.mrb[0].mxu0 %vm55_vm1, %v43_v8 }
 0x104   :  { %v125_v10 = vpop.f32.mrb[0].mxu0 }
 0x105   :  { %v126_v11 = vadd.f32 %v150_v9, %v125_v10  ;;  %v167_v12 = vpop.f32.mrb[1].mxu0 }
 0x107   :  { %vm129_vm2 = vcmp.ge.f32.partialorder %v126_v11, 0.0 }
 0x108   :  { %vm130_vm3 = vmpackc.low %vm129_vm2, %vm129_vm2 }
 0x109   :  { %vm131_vm4 = vmpackc.even %vm130_vm3, %vm130_vm3 }
 0x10a   :  { %v132_v14 = vsel %vm131_vm4, 16843009, %v263_v13 }
 0x10b   :  { %133 = vst [vmem:[#allocation7] sm:$0x3] %v132_v14 }
 0x10c   :  { %238 = shalt.err (!%p235_p6)
}
 0x10d   :  { %s239_s15 = scalar_lea.hbm %s333_s3, 32 }
 0x10e   :  { %p240_p7 = scmp.ne.s32.totalorder %s333_s3, %s239_s15  ;;  %p243_p8 = scmp.lt.u32.totalorder %s239_s15, %s333_s3 }
 0x110   :  { %p245_p9 = pnand %p243_p8, %p240_p7 }
 0x112   :  { %248 = shalt.err (!%p245_p9)
}
 0x113   :  { %143 = dma.vmem_to_hbm [thread:$0]  %s141_s12, 32, %s333_s3, [#allocation4]  }
 0x114   :  { %253 = dma.done.wait [#allocation4], 32  }
 0x115   :  { %254 = vsyncadd [#allocation4], 4294967264 }
 0x116   :  { %147 = vsyncpa [#allocation3], 1 }
 0x117   :  { %148 = vsyncpa [#allocation6], 1 }
 0x118   :  { %149 = vsyncpa [#allocation4], 1 }

</bundles_post_ra>
